<compile_context>
chip_gen: v6e
topology: v6e:2x2x1
jax: 0.10.0
libtpu: 0.0.40
codegen_flags: <defaults>
</compile_context>

<pallas_src>
import functools

import numpy as np
import jax
import jax.numpy as jnp
from jax.experimental import pallas as pl
from jax.experimental.pallas import tpu as pltpu


def _round_up(x, m):
    return (x + m - 1) // m * m


def _clip_encoder_kernel(x_ref, w_ref, b_ref, g_ref, be_ref, o_ref, acc_ref,
                         *, num_layers, eps, h_true, weights_resident):
    l = pl.program_id(1)

    # Load the activation tile into the running accumulator (compute_dtype)
    # on the first layer step of this M tile.
    @pl.when(l == 0)
    def _():
        acc_ref[...] = x_ref[...]

    # One Linear (+bias) + ReLU per grid step along the layer axis.
    a = acc_ref[...]
    w = w_ref[l] if weights_resident else w_ref[0]      # (Hp, Hp)
    y = jnp.dot(a, w, preferred_element_type=jnp.float32)
    y = jnp.maximum(y + b_ref[l].astype(jnp.float32), 0.0)   # f32 bias + ReLU

    # Store back to the (compute_dtype) accumulator for the next layer only;
    # the last layer's f32 result feeds LayerNorm directly (no bf16 rounding).
    @pl.when(l < num_layers - 1)
    def _():
        acc_ref[...] = y.astype(acc_ref.dtype)

    # LayerNorm epilogue + store only on the last layer step.
    @pl.when(l == num_layers - 1)
    def _():
        hp = y.shape[-1]
        inv_h = 1.0 / h_true
        # Padded lanes are exactly zero (zero-padded weights & biases + ReLU),
        # so the sum is already over the true H.
        mean = jnp.sum(y, axis=-1, keepdims=True) * inv_h
        if hp == h_true:
            centered = y - mean
        else:
            lane = jax.lax.broadcasted_iota(jnp.int32, y.shape, dimension=1)
            centered = jnp.where(lane < h_true, y - mean, 0.0)
        var = jnp.sum(centered * centered, axis=-1, keepdims=True) * inv_h
        inv = jax.lax.rsqrt(var + eps)                  # EUP rsqrt
        out = centered * inv * g_ref[...] + be_ref[...]
        o_ref[...] = out.astype(o_ref.dtype)


def clip_encoder_forward(x, weights, biases, gamma, beta, *, eps=1e-5,
                         compute_dtype=jnp.bfloat16, tile_m=None):
    """x: [B, S, H]. weights: [L, H, H] stored (in, out) so y = x @ W + b."""
    B, S, H = x.shape
    L = weights.shape[0]
    M = B * S

    # Lane padding (multiple of 128) only when H requires it; M tile multiple
    # of 8 sublanes.  Ensure >= 2 M tiles when M allows (v7x: 2 TCs/chip).
    Hp = _round_up(H, 128)
    if tile_m is None:
        if M >= 1024:
            tile_m = 512
        elif M >= 16:
            tile_m = _round_up((M + 1) // 2, 8)
        else:
            tile_m = _round_up(max(M, 1), 8)
    TM = tile_m
    Mp = _round_up(M, TM)
    num_m_tiles = Mp // TM

    w_itemsize = np.dtype(compute_dtype).itemsize
    x_itemsize = np.dtype(compute_dtype).itemsize

    # Physical VMEM budget (v7x: 64 MiB / TC; v5e/v6e: 128 MiB).
    try:
        vmem_cap = int(pltpu.get_tpu_info().vmem_capacity_bytes)
    except Exception:
        vmem_cap = 64 * 1024 * 1024

    weight_stack_bytes = L * Hp * Hp * w_itemsize
    act_bytes = (2 * TM * Hp * x_itemsize        # x blocks (double-buffered)
                 + 2 * TM * Hp * 4               # out blocks
                 + TM * Hp * x_itemsize          # acc scratch
                 + L * Hp * 4 + 2 * Hp * 4)      # bias stack + gamma/beta
    # Full weight residency (single HBM pass) only when it comfortably fits
    # (count 2x for pipelining buffers to stay conservative on v7x).
    weights_resident = (2 * weight_stack_bytes + act_bytes) <= int(0.7 * vmem_cap)

    if weights_resident:
        w_vmem = 2 * weight_stack_bytes
        w_hbm = weight_stack_bytes
        w_spec = pl.BlockSpec((L, Hp, Hp), lambda i, l: (0, 0, 0))
    else:
        w_vmem = 2 * Hp * Hp * w_itemsize
        w_hbm = weight_stack_bytes * num_m_tiles
        w_spec = pl.BlockSpec((1, Hp, Hp), lambda i, l: (l, 0, 0))

    vmem_bytes = act_bytes + w_vmem
    vmem_limit = int(min(max(int(1.25 * vmem_bytes), 16 * 1024 * 1024),
                         int(0.85 * vmem_cap)))

    # Prepare (and pad only if needed) the operands.
    x2d = x.reshape(M, H).astype(compute_dtype)
    w = weights.astype(compute_dtype)
    b = biases.astype(jnp.float32)
    g = gamma.astype(jnp.float32)
    be = beta.astype(jnp.float32)
    if Mp != M or Hp != H:
        x2d = jnp.pad(x2d, ((0, Mp - M), (0, Hp - H)))
    if Hp != H:
        w = jnp.pad(w, ((0, 0), (0, Hp - H), (0, Hp - H)))
        b = jnp.pad(b, ((0, 0), (0, Hp - H)))
        g = jnp.pad(g, (0, Hp - H))
        be = jnp.pad(be, (0, Hp - H))
    b = b.reshape(L, 1, Hp)
    g = g.reshape(1, Hp)
    be = be.reshape(1, Hp)

    kernel = functools.partial(
        _clip_encoder_kernel, num_layers=L, eps=eps, h_true=H,
        weights_resident=weights_resident)

    cost = pl.CostEstimate(
        flops=int(2 * Mp * Hp * Hp * L),
        transcendentals=int(Mp),
        bytes_accessed=int(w_hbm + Mp * Hp * x_itemsize + Mp * Hp * 4
                           + L * Hp * 4),
    )

    out = pl.pallas_call(
        kernel,
        out_shape=jax.ShapeDtypeStruct((Mp, Hp), jnp.float32),
        grid_spec=pltpu.PrefetchScalarGridSpec(
            num_scalar_prefetch=0,
            grid=(num_m_tiles, L),
            in_specs=[
                pl.BlockSpec((TM, Hp), lambda i, l: (i, 0)),        # x
                w_spec,                                             # weights
                pl.BlockSpec((L, 1, Hp), lambda i, l: (0, 0, 0)),   # bias stack
                pl.BlockSpec((1, Hp), lambda i, l: (0, 0)),         # gamma
                pl.BlockSpec((1, Hp), lambda i, l: (0, 0)),         # beta
            ],
            out_specs=pl.BlockSpec((TM, Hp), lambda i, l: (i, 0)),
            scratch_shapes=[pltpu.VMEM((TM, Hp), compute_dtype)],
        ),
        compiler_params=pltpu.CompilerParams(
            dimension_semantics=("parallel", "arbitrary"),
            vmem_limit_bytes=vmem_limit,
        ),
        cost_estimate=cost,
    )(x2d, w, b, g, be)

    if Mp != M or Hp != H:
        out = out[:M, :H]
    return out.reshape(B, S, H)


def reference_forward(x, weights, biases, gamma, beta, *, eps=1e-5):
    """Pure-JAX reference matching the PyTorch module semantics."""
    y = x
    L = weights.shape[0]
    for l in range(L):
        y = jnp.maximum(jnp.einsum("bsh,ho->bso", y, weights[l]) + biases[l], 0.0)
    mean = jnp.mean(y, axis=-1, keepdims=True)
    var = jnp.mean((y - mean) ** 2, axis=-1, keepdims=True)
    return (y - mean) / jnp.sqrt(var + eps) * gamma + beta


if __name__ == "__main__":
    # Small config consistent with the module: hidden_size=32, num_hidden_layers=3.
    B, S, H, L = 2, 8, 32, 3
    eps = 1e-5

    key = jax.random.PRNGKey(0)
    kx, kw, kb, kg, kbe = jax.random.split(key, 5)

    x = jax.random.normal(kx, (B, S, H), dtype=jnp.float32)

    # torch Linear weight is (out, in); we store the transposed (in, out) form
    # directly for the kernel's x @ W layout.
    weights = jax.random.normal(kw, (L, H, H), dtype=jnp.float32) * (1.0 / jnp.sqrt(H))
    biases = jax.random.normal(kb, (L, H), dtype=jnp.float32) * 0.01
    gamma = jnp.ones((H,), dtype=jnp.float32) + 0.1 * jax.random.normal(kg, (H,), dtype=jnp.float32)
    beta = 0.1 * jax.random.normal(kbe, (H,), dtype=jnp.float32)

    ref = reference_forward(x, weights, biases, gamma, beta, eps=eps)

    # f32 MXU path: tight tolerance.
    out_f32 = clip_encoder_forward(x, weights, biases, gamma, beta, eps=eps,
                                   compute_dtype=jnp.float32)
    out_f32 = jax.block_until_ready(out_f32)
    assert out_f32.shape == (B, S, H)
    assert jnp.allclose(out_f32, ref, atol=1e-4, rtol=1e-4), "f32 mismatch vs reference"

    # Default bf16 MXU path (recommended on v5e/v6e/v7x): looser tolerance
    # since intermediate activations are rounded to bf16 each layer.
    out_bf16 = clip_encoder_forward(x, weights, biases, gamma, beta, eps=eps)
    out_bf16 = jax.block_until_ready(out_bf16)
    assert out_bf16.shape == (B, S, H)
    assert jnp.allclose(out_bf16, ref, atol=1e-1, rtol=1e-1), "bf16 mismatch vs reference"

    print("KERNEL_OK")
</pallas_src>

<mosaic_0001>
module attributes {stable_mosaic.version = 11 : i64} {
  func.func @_clip_encoder_kernel(%arg0: i32, %arg1: i32, %arg2: memref<8x128xf32, #tpu.memory_space<vmem>>, %arg3: memref<3x128x128xf32, #tpu.memory_space<vmem>>, %arg4: memref<3x1x128xf32, #tpu.memory_space<vmem>>, %arg5: memref<1x128xf32, #tpu.memory_space<vmem>>, %arg6: memref<1x128xf32, #tpu.memory_space<vmem>>, %arg7: memref<8x128xf32, #tpu.memory_space<vmem>>, %arg8: memref<8x128xf32, #tpu.memory_space<vmem>>) attributes {dimension_semantics = [#tpu.dimension_semantics<parallel>, #tpu.dimension_semantics<arbitrary>], iteration_bounds = array<i64: 2, 3>, scalar_prefetch = 0 : i64, scratch_operands = 1 : i64, tpu.core_type = #tpu.core_type<tc>, window_params = [{transform_indices = @transform_0, window_bounds = array<i64: 8, 128>}, {pipeline_mode = #tpu.pipeline_mode<synchronous>, transform_indices = @transform_1, window_bounds = array<i64: 3, 128, 128>}, {pipeline_mode = #tpu.pipeline_mode<synchronous>, transform_indices = @transform_2, window_bounds = array<i64: 3, 1, 128>}, {pipeline_mode = #tpu.pipeline_mode<synchronous>, transform_indices = @transform_3, window_bounds = array<i64: 1, 128>}, {pipeline_mode = #tpu.pipeline_mode<synchronous>, transform_indices = @transform_4, window_bounds = array<i64: 1, 128>}, {transform_indices = @transform_5, window_bounds = array<i64: 8, 128>}]} {
    %c0_i32 = arith.constant 0 : i32
    %0 = arith.cmpi eq, %arg1, %c0_i32 : i32
    %1 = arith.extui %0 : i1 to i32
    %c0_i32_0 = arith.constant 0 : i32
    %2 = arith.cmpi ne, %1, %c0_i32_0 : i32
    scf.if %2 {
      %c0_10 = arith.constant 0 : index
      %c0_11 = arith.constant 0 : index
      %21 = vector.load %arg2[%c0_10, %c0_11] : memref<8x128xf32, #tpu.memory_space<vmem>>, vector<8x128xf32>
      %c0_12 = arith.constant 0 : index
      %c0_13 = arith.constant 0 : index
      %22 = vector.load %arg8[%c0_12, %c0_13] : memref<8x128xf32, #tpu.memory_space<vmem>>, vector<8x128xf32>
      tpu.vector_store %arg8[%c0_12, %c0_13], %21 {strides = array<i32>} : memref<8x128xf32, #tpu.memory_space<vmem>>, vector<8x128xf32>,
    } else {
    }
    %c0 = arith.constant 0 : index
    %c0_1 = arith.constant 0 : index
    %3 = vector.load %arg8[%c0, %c0_1] : memref<8x128xf32, #tpu.memory_space<vmem>>, vector<8x128xf32>
    %4 = arith.index_cast %arg1 : i32 to index
    %c0_2 = arith.constant 0 : index
    %c0_3 = arith.constant 0 : index
    %5 = vector.load %arg3[%4, %c0_2, %c0_3] : memref<3x128x128xf32, #tpu.memory_space<vmem>>, vector<1x128x128xf32>
    %6 = vector.shape_cast %5 : vector<1x128x128xf32> to vector<128x128xf32>
    %cst = arith.constant dense<0.000000e+00> : vector<8x128xf32>
    %7 = tpu.matmul %3, %6, %cst {dimension_numbers = #tpu.dot_dimension_numbers<[1], [0], [0], [1], [0, 0, 1, 1], [], []>} : vector<8x128xf32>, vector<128x128xf32>, vector<8x128xf32> -> vector<8x128xf32>
    %8 = arith.index_cast %arg1 : i32 to index
    %c0_4 = arith.constant 0 : index
    %c0_5 = arith.constant 0 : index
    %9 = vector.load %arg4[%8, %c0_4, %c0_5] : memref<3x1x128xf32, #tpu.memory_space<vmem>>, vector<1x1x128xf32>
    %10 = vector.shape_cast %9 : vector<1x1x128xf32> to vector<1x128xf32>
    %11 = vector.broadcast %10 : vector<1x128xf32> to vector<8x128xf32>
    %12 = arith.addf %7, %11 : vector<8x128xf32>
    %cst_6 = arith.constant 0.000000e+00 : f32
    %13 = vector.broadcast %cst_6 : f32 to vector<8x128xf32>
    %14 = arith.maximumf %12, %13 : vector<8x128xf32>
    %c2_i32 = arith.constant 2 : i32
    %15 = arith.cmpi slt, %arg1, %c2_i32 : i32
    %16 = arith.extui %15 : i1 to i32
    %c0_i32_7 = arith.constant 0 : i32
    %17 = arith.cmpi ne, %16, %c0_i32_7 : i32
    scf.if %17 {
      %c0_10 = arith.constant 0 : index
      %c0_11 = arith.constant 0 : index
      %21 = vector.load %arg8[%c0_10, %c0_11] : memref<8x128xf32, #tpu.memory_space<vmem>>, vector<8x128xf32>
      tpu.vector_store %arg8[%c0_10, %c0_11], %14 {strides = array<i32>} : memref<8x128xf32, #tpu.memory_space<vmem>>, vector<8x128xf32>,
    } else {
    }
    %c2_i32_8 = arith.constant 2 : i32
    %18 = arith.cmpi eq, %arg1, %c2_i32_8 : i32
    %19 = arith.extui %18 : i1 to i32
    %c0_i32_9 = arith.constant 0 : i32
    %20 = arith.cmpi ne, %19, %c0_i32_9 : i32
    scf.if %20 {
      %cst_10 = arith.constant dense<0.000000e+00> : vector<8xf32>
      %21 = vector.multi_reduction <add>, %14, %cst_10 [1] : vector<8x128xf32> to vector<8xf32>
      %22 = vector.shape_cast %21 : vector<8xf32> to vector<8x1xf32>
      %cst_11 = arith.constant 3.125000e-02 : f32
      %23 = vector.broadcast %cst_11 : f32 to vector<8x1xf32>
      %24 = arith.mulf %22, %23 : vector<8x1xf32>
      %25 = tpu.iota {dimensions = array<i32: 1>} : vector<8x128xi32>
      %c32_i32 = arith.constant 32 : i32
      %26 = vector.broadcast %c32_i32 : i32 to vector<8x128xi32>
      %27 = arith.cmpi slt, %25, %26 : vector<8x128xi32>
      %28 = vector.broadcast %24 : vector<8x1xf32> to vector<8x128xf32>
      %29 = arith.subf %14, %28 : vector<8x128xf32>
      %cst_12 = arith.constant 0.000000e+00 : f32
      %30 = vector.broadcast %cst_12 : f32 to vector<8x128xf32>
      %31 = arith.select %27, %29, %30 : vector<8x128xi1>, vector<8x128xf32>
      %32 = arith.mulf %31, %31 : vector<8x128xf32>
      %cst_13 = arith.constant dense<0.000000e+00> : vector<8xf32>
      %33 = vector.multi_reduction <add>, %32, %cst_13 [1] : vector<8x128xf32> to vector<8xf32>
      %34 = vector.shape_cast %33 : vector<8xf32> to vector<8x1xf32>
      %cst_14 = arith.constant 3.125000e-02 : f32
      %35 = vector.broadcast %cst_14 : f32 to vector<8x1xf32>
      %36 = arith.mulf %34, %35 : vector<8x1xf32>
      %cst_15 = arith.constant 9.99999974E-6 : f32
      %37 = vector.broadcast %cst_15 : f32 to vector<8x1xf32>
      %38 = arith.addf %36, %37 : vector<8x1xf32>
      %39 = math.rsqrt %38 : vector<8x1xf32>
      %40 = vector.broadcast %39 : vector<8x1xf32> to vector<8x128xf32>
      %41 = arith.mulf %31, %40 : vector<8x128xf32>
      %c0_16 = arith.constant 0 : index
      %c0_17 = arith.constant 0 : index
      %42 = vector.load %arg5[%c0_16, %c0_17] : memref<1x128xf32, #tpu.memory_space<vmem>>, vector<1x128xf32>
      %43 = vector.broadcast %42 : vector<1x128xf32> to vector<8x128xf32>
      %44 = arith.mulf %41, %43 : vector<8x128xf32>
      %c0_18 = arith.constant 0 : index
      %c0_19 = arith.constant 0 : index
      %45 = vector.load %arg6[%c0_18, %c0_19] : memref<1x128xf32, #tpu.memory_space<vmem>>, vector<1x128xf32>
      %46 = vector.broadcast %45 : vector<1x128xf32> to vector<8x128xf32>
      %47 = arith.addf %44, %46 : vector<8x128xf32>
      %c0_20 = arith.constant 0 : index
      %c0_21 = arith.constant 0 : index
      %48 = vector.load %arg7[%c0_20, %c0_21] : memref<8x128xf32, #tpu.memory_space<vmem>>, vector<8x128xf32>
      tpu.vector_store %arg7[%c0_20, %c0_21], %47 {strides = array<i32>} : memref<8x128xf32, #tpu.memory_space<vmem>>, vector<8x128xf32>,
    } else {
    }
    return
  }
  func.func @transform_0(%arg0: i32, %arg1: i32) -> (i32, i32) {
    %c0_i32 = arith.constant 0 : i32
    %c0_i32_0 = arith.constant 0 : i32
    return %arg0, %c0_i32 : i32, i32
  }
  func.func @transform_1(%arg0: i32, %arg1: i32) -> (i32, i32, i32) {
    %c0_i32 = arith.constant 0 : i32
    %c0_i32_0 = arith.constant 0 : i32
    %c0_i32_1 = arith.constant 0 : i32
    %c0_i32_2 = arith.constant 0 : i32
    return %c0_i32, %c0_i32_0, %c0_i32_1 : i32, i32, i32
  }
  func.func @transform_2(%arg0: i32, %arg1: i32) -> (i32, i32, i32) {
    %c0_i32 = arith.constant 0 : i32
    %c0_i32_0 = arith.constant 0 : i32
    %c0_i32_1 = arith.constant 0 : i32
    %c0_i32_2 = arith.constant 0 : i32
    return %c0_i32, %c0_i32_0, %c0_i32_1 : i32, i32, i32
  }
  func.func @transform_3(%arg0: i32, %arg1: i32) -> (i32, i32) {
    %c0_i32 = arith.constant 0 : i32
    %c0_i32_0 = arith.constant 0 : i32
    %c0_i32_1 = arith.constant 0 : i32
    return %c0_i32, %c0_i32_0 : i32, i32
  }
  func.func @transform_4(%arg0: i32, %arg1: i32) -> (i32, i32) {
    %c0_i32 = arith.constant 0 : i32
    %c0_i32_0 = arith.constant 0 : i32
    %c0_i32_1 = arith.constant 0 : i32
    return %c0_i32, %c0_i32_0 : i32, i32
  }
  func.func @transform_5(%arg0: i32, %arg1: i32) -> (i32, i32) {
    %c0_i32 = arith.constant 0 : i32
    %c0_i32_0 = arith.constant 0 : i32
    return %arg0, %c0_i32 : i32, i32
  }
}

</mosaic_0001>

<bundles_post_ra>
// kernel: tpu_custom_call.1
= control target key start
LH: loop header
LB: loop body
LE: loop exit
PB: predicated region body
PF: predicated region fallthrough
CT: control target
= control target key end

     0   :  { %s1091_s0 = inlined_call_operand.hbm [shape: f32[16,128], index: 0, kind: input, shape index: {}]   ;;  %s1092_s1 = inlined_call_operand.hbm [shape: f32[3,128,128], index: 1, kind: input, shape index: {}]   ;;  %s1093_s2 = inlined_call_operand.vmem [shape: f32[3,1,128], index: 2, kind: input, shape index: {}]   ;;  %s1094_s3 = inlined_call_operand.vmem [shape: f32[1,128], index: 3, kind: input, shape index: {}]   ;;  %s1095_s4 = inlined_call_operand.vmem [shape: f32[1,128], index: 4, kind: input, shape index: {}]   ;;  %s1096_s5 = inlined_call_operand.hbm [shape: f32[16,128], index: 5, kind: output, shape index: {}]  }
   0x1   :  { %1099 = sst [smem:[#allocation14_spill]] %s1092_s1 }
   0x2   :  { %10 = vsyncpa [#allocation4], 0 }
   0x3   :  { %12 = vsyncpa [#allocation4 + $0x1], 0 }
   0x4   :  { %13 = vsyncpa [#allocation7], 0 }
   0x5   :  { %14 = vsyncpa [#allocation5], 0 }
   0x6   :  { %16 = vsyncpa [#allocation5 + $0x1], 0  ;;  %s882_s18 = smov 0   ;;  %s884_s19 = smov 0  }
   0x7   :  { %s886_s20 = smov 0   ;;  %s888_s21 = smov 0  }
   0x8   :  { %s890_s22 = smov 0   ;;  %s892_s23 = smov 0  }
   0x9   :  { %s894_s24 = smov 0   ;;  %s896_s25 = smov 0  }
   0xa LB: > { %1100 = sst [smem:[#allocation12_spill]] %s835_s23  ;;  %s520_s26 = sadd.s32 4294967295, %s843_s25   ;;  %s843_s25 = sphi %s896_s25, %s22_s25   ;;  %s839_s24 = sphi %s894_s24, %s1118_s24   ;;  %s835_s23 = sphi %s892_s23, %s1113_s23   ;;  %s831_s22 = sphi %s890_s22, %s1117_s22   ;;  %s827_s21 = sphi %s888_s21, %s1112_s21   ;;  %s823_s20 = sphi %s886_s20, %s1116_s20   ;;  %s819_s19 = sphi %s884_s19, %s1115_s19   ;;  %s815_s18 = sphi %s882_s18, %s1114_s18  }
   0xb   : > { %s521_s27 = sadd.s32 4294967294, %s843_s25   ;;  %p54_p0 = scmp.ne.s32.totalorder %s819_s19, %s815_s18 }
   0xc   : > { %p926_p1 = scmp.eq.s32.totalorder %s520_s26, 0  ;;  %p930_p2 = scmp.eq.s32.totalorder %s520_s26, 5 }
   0xd   : > { %p168_p3 = scmp.eq.s32.totalorder %s521_s27, 5  ;;  %p522_p5 = scmp.ge.s32.totalorder %s843_s25, 1 }
   0xe   : > { %p936_p4 = por %p926_p1, %p54_p0  ;;  %p175_p7 = scmp.lt.s32.totalorder %s843_s25, 7 }
   0xf   : > { %p941_p6 = por %p168_p3, %p54_p0  ;;  %s845_s8 = smov [#allocation6]  }
  0x10   : > { %s1103_s30 = scalar_select %p936_p4, 1, 0 }
  0x11   : > { %s1104_s6 = scalar_select %p941_p6, 1, 0 }
  0x12   : > { %p946_p8 = pnand %p522_p5, %p175_p7  ;;  %s187_s9 = sshll.u32 %s845_s8, 4  ;;  %s188_s9 = int_to_ptr.vmem [resolvable:$true] %s187_s9 }
  0x13   : > { %s700_s10 = scalar_lea.vmem %s188_s9, 6144  ;;  %p708_p3 = scmp.lt.s32.totalorder %s188_s9, %s188_s9 }
  0x14   : > { %p602_p9 = pneg %p946_p8  ;;  %p701_p12 = scmp.ne.s32.totalorder %s188_s9, %s700_s10 }
  0x15   : > { %p709_p6 = scmp.lt.s32.totalorder %s700_s10, %s700_s10 }
  0x16   : > { %p603_p10 = pnand %p602_p9, %p926_p1 }
  0x17   : > { %p710_p4 = por %p709_p6, %p708_p3 }
  0x18   : > { %p691_p11 = pneg %p603_p10 }
  0x1a   : > { %p703_p13 = pnand %p701_p12, %p691_p11 }
  0x1c   : > { %p704_p0 = pneg %p703_p13 }
  0x1e   : > { %p711_p5 = pnand %p710_p4, %p704_p0 }
  0x20   : > { %714 = shalt.err (!%p711_p5)
}
  0x21   : > { %s846_s11 = smov 128   ;;  %s847_s12 = smov 8  }
  0x22   : > { %s1106_s1 = sld [smem:[#allocation14_spill]]  ;;  %s31_s15 = sadd.s32 1, %s835_s23 }
  0x23   : > { %p32_p4 = scmp.ge.s32.totalorder %s31_s15, 3  ;;  %s34_s16 = sadd.s32 1, %s839_s24 }
  0x24   : > { %s41_s17 = sadd.s32 1, %s823_s20  ;;  %p48_p6 = scmp.ne.s32.totalorder %s823_s20, %s819_s19 }
  0x25   : > { %s1120_s15 = smov (%p32_p4, %s31_s15), 0  ;;  %s1122_s16 = smov (!%p32_p4, %s34_s16), %s839_s24 }
  0x26   : > { %1107 = sst [smem:[#allocation13_spill]] %s1120_s15  ;;  %p49_p7 = scmp.eq.s32.totalorder %s843_s25, 0 }
  0x27   : > { %p968_p9 = por %p930_p2, %p48_p6  ;;  %p36_p11 = scmp.ge.s32.totalorder %s1122_s16, 2 }
  0x28   : > { %605 = dma.hbm_to_vmem [thread:$0]  (!%p603_p10), %s1106_s1, 6144, %s188_s9, [#allocation7], %s846_s11, %s846_s11, %s847_s12  }
  0x29   : > { %p615_p10 = scmp.lt.s32.totalorder %s843_s25, 6  ;;  %p50_p12 = por %p49_p7, %p48_p6 }
  0x2a   : > { %s210_s27 = sand.u32 1, %s823_s20   ;;  %s1124_s16 = smov (%p36_p11, %s1122_s16), 0 }
  0x2b   : > { %s525_s8 = sshll.u32 %s210_s27, 3  ;;  %s38_s9 = ssub.s32 %s839_s24, %s1124_s16 }
  0x2c   : > { %p39_p13 = scmp.eq.s32.totalorder %s38_s9, 0  ;;  %s526_s10 = sshll.u32 %s839_s24, 7 }
  0x2d   : > { %s219_s29 = scalar_lea.hbm %s1091_s0, %s526_s10  ;;  %s214_s13 = scalar_lea.vmem [#allocation3], %s525_s8 }
  0x2e   : > { %s221_s14 = sshll.u32 %s214_s13, 4  ;;  %p987_p2 = pnand %p615_p10, %p50_p12  ;;  %s222_s14 = int_to_ptr.vmem [resolvable:$true] %s221_s14 }
  0x2f   : > { %s983_s1 = scalar_select %p39_p13, %s823_s20, %s41_s17  }
  0x30   : > { %s211_s23 = scalar_lea.sflag [#allocation4], %s210_s27  ;;  %p717_p0 = pneg %p987_p2 }
  0x31   : > { %s728_s9 = scalar_lea.vmem %s222_s14, 128  ;;  %s848_s11 = smov [#allocation3]  }
  0x32   : > { %p729_p3 = scmp.ne.s32.totalorder %s222_s14, %s728_s9  ;;  %s733_s10 = sshll.u32 %s848_s11, 4  ;;  %s734_s10 = int_to_ptr.vmem [resolvable:$false] %s733_s10 }
  0x33   : > { %s735_s8 = scalar_lea.vmem %s734_s10, 256  ;;  %p736_p6 = scmp.lt.s32.totalorder %s222_s14, %s734_s10 }
  0x34   : > { %p731_p5 = pnand %p729_p3, %p717_p0  ;;  %p737_p7 = scmp.lt.s32.totalorder %s735_s8, %s728_s9 }
  0x36   : > { %p732_p4 = pneg %p731_p5  ;;  %p738_p11 = por %p737_p7, %p736_p6 }
  0x38   : > { %p739_p13 = pnand %p738_p11, %p732_p4 }
  0x3a   : > { %742 = shalt.err (!%p739_p13)
}
  0x3b   : > { %609 = dma.hbm_to_vmem [thread:$0]  (!%p987_p2), %s219_s29, 128, %s222_s14, %s211_s23  }
  0x3c   : > { %230 = sbr.rel (%p946_p8) target bundleno = 647 (0x287), region = 40  ;;  %s998_s17 = sand.u32 (!%p946_p8), 1, %s819_s19  }
  0x3d   : > { %s528_s27 = sshll.u32 (!%p946_p8), %s998_s17, 3  ;;  %s233_s12 = scalar_lea.sflag (!%p946_p8), [#allocation4], %s998_s17 }
  0x3e   : > { %s236_s13 = scalar_lea.vmem (!%p946_p8), [#allocation3], %s528_s27  ;;  %p1110_p10 = scmp.ne.s32.totalorder (!%p946_p8), %s1103_s30, 0 }
  0x41   : > { %802 = dma.done.wait (%p1110_p10), %s233_s12, 128  }
  0x42   : > { %804 = vsyncadd (%p1110_p10), %s233_s12, 4294967168 }
  0x43   : > { %806 = dma.done.wait (%p926_p1), [#allocation7], 6144  }
  0x44   : > { %808 = vsyncadd (%p926_p1), [#allocation7], 4294961152  ;;  %s1010_s23 = scalar_lea.vmem [#allocation8], %s528_s27  ;;  %p531_p8 = scmp.ne.s32.totalorder %s827_s21, 0 }
  0x46   : > { %270 = sbr.rel (%p531_p8) target bundleno = 77 (0x4d), region = 52 }
  0x4b   : > { %v271_v0 = vld [vmem:[%s236_s13] sm:$0xff] }
  0x4c   : > { %272 = vst [vmem:[#allocation2] sm:$0xff] %v271_v0 }
  0x4d PF: > { %s532_s7 = sshll.u32 %s827_s21, 7  ;;  %v849_v1 = vmov 0.0   ;;  %vm850_vm0 = vmmov 0   ;;  %s292_s29 = scalar_lea.vmem %s1093_s2, %s827_s21 }
  0x4e   : > { %559 = vmatprep.subr.mxu0 %v849_v1  ;;  %591 = vmatprep.mubr.msk.f32.mxu0 %vm850_vm0, %v849_v1  ;;  %s1014_s30 = scalar_lea.vmem [#allocation6], %s532_s7  ;;  %v533_v19 = vld [vmem:[%s292_s29] ss:$0 sm:$0xff]  ;;  %p534_p1 = scmp.ge.s32.totalorder %s827_s21, 2 }
  0x4f   : > { %v291_v2 = vld [vmem:[%s1014_s30 + $0x78] sm:$0xff]  ;;  %v290_v3 = vld [vmem:[%s1014_s30 + $0x70] sm:$0xff]  ;;  %v289_v4 = vld [vmem:[%s1014_s30 + $0x68] sm:$0xff] }
  0x50   : > { %560 = vmatpush3.msra.mxu0 %v291_v2  ;;  %v288_v5 = vld [vmem:[%s1014_s30 + $0x60] sm:$0xff]  ;;  %v287_v6 = vld [vmem:[%s1014_s30 + $0x58] sm:$0xff]  ;;  %v286_v7 = vld [vmem:[%s1014_s30 + $0x50] sm:$0xff] }
  0x51   : > { %561 = vmatprep.subr.mxu0 %v849_v1  ;;  %v285_v8 = vld [vmem:[%s1014_s30 + $0x48] sm:$0xff]  ;;  %v284_v9 = vld [vmem:[%s1014_s30 + $0x40] sm:$0xff]  ;;  %v283_v10 = vld [vmem:[%s1014_s30 + $0x38] sm:$0xff] }
  0x52   : > { %562 = vmatpush3.msra.mxu0 %v290_v3  ;;  %v282_v11 = vld [vmem:[%s1014_s30 + $0x30] sm:$0xff]  ;;  %v281_v12 = vld [vmem:[%s1014_s30 + $0x28] sm:$0xff]  ;;  %v280_v13 = vld [vmem:[%s1014_s30 + $0x20] sm:$0xff] }
  0x53   : > { %563 = vmatprep.subr.mxu0 %v849_v1  ;;  %v279_v14 = vld [vmem:[%s1014_s30 + $0x18] sm:$0xff]  ;;  %v278_v15 = vld [vmem:[%s1014_s30 + $0x10] sm:$0xff]  ;;  %v277_v16 = vld [vmem:[%s1014_s30 + $0x8] sm:$0xff] }
  0x54   : > { %564 = vmatpush3.msra.mxu0 %v289_v4  ;;  %v276_v17 = vld [vmem:[%s1014_s30] sm:$0xff] }
  0x55   : > { %565 = vmatprep.subr.mxu0 %v849_v1  ;;  %v273_v18 = vld [vmem:[#allocation2] sm:$0xff] }
  0x56   : > { %566 = vmatpush3.msra.mxu0 %v288_v5 }
  0x57   : > { %567 = vmatprep.subr.mxu0 %v849_v1 }
  0x58   : > { %568 = vmatpush3.msra.mxu0 %v287_v6 }
  0x59   : > { %569 = vmatprep.subr.mxu0 %v849_v1 }
  0x5a   : > { %570 = vmatpush3.msra.mxu0 %v286_v7 }
  0x5b   : > { %571 = vmatprep.subr.mxu0 %v849_v1 }
  0x5c   : > { %572 = vmatpush3.msra.mxu0 %v285_v8 }
  0x5d   : > { %573 = vmatprep.subr.mxu0 %v849_v1 }
  0x5e   : > { %574 = vmatpush3.msra.mxu0 %v284_v9 }
  0x5f   : > { %575 = vmatprep.subr.mxu0 %v849_v1 }
  0x60   : > { %576 = vmatpush3.msra.mxu0 %v283_v10 }
  0x61   : > { %577 = vmatprep.subr.mxu0 %v849_v1 }
  0x62   : > { %578 = vmatpush3.msra.mxu0 %v282_v11 }
  0x63   : > { %579 = vmatprep.subr.mxu0 %v849_v1 }
  0x64   : > { %580 = vmatpush3.msra.mxu0 %v281_v12 }
  0x65   : > { %581 = vmatprep.subr.mxu0 %v849_v1 }
  0x66   : > { %582 = vmatpush3.msra.mxu0 %v280_v13 }
  0x67   : > { %583 = vmatprep.subr.mxu0 %v849_v1 }
  0x68   : > { %584 = vmatpush3.msra.mxu0 %v279_v14 }
  0x69   : > { %585 = vmatprep.subr.mxu0 %v849_v1 }
  0x6a   : > { %586 = vmatpush3.msra.mxu0 %v278_v15 }
  0x6b   : > { %587 = vmatprep.subr.mxu0 %v849_v1 }
  0x6c   : > { %588 = vmatpush3.msra.mxu0 %v277_v16 }
  0x6d   : > { %589 = vmatprep.subr.mxu0 %v849_v1 }
  0x6e   : > { %590 = vmatpush3.msra.mxu0 %v276_v17 }
  0x6f   : > { %592 = vmatmul.mubr.f32.vlgmr.msra.gmra.mxu0 %v273_v18 }
 0x12e   : > { %374 = sbr.rel (%p534_p1) target bundleno = 309 (0x135), region = 56 }
 0x12f   : > { %v366_v20 = vpop.f32.mrf.mxu0 }
 0x130   : > { %v367_v21 = vadd.f32 %v533_v19, %v366_v20 }
 0x131   : > { %v593_v22 = vpop.f32.mrf.mxu0 }
 0x132   : > { %v370_v23 = vmax.f32 %v367_v21, 0.0 }
 0x134   : > { %375 = vst [vmem:[#allocation2] sm:$0xff] %v370_v23 }
 0x135 PF: > { %p535_p12 = scmp.ne.s32.totalorder %s827_s21, 2 }
 0x137   : > { %379 = sbr.rel (%p535_p12) target bundleno = 624 (0x270), region = 60 }
 0x13c   : > { %380 = vadd.xlane.f32.xlu0 %v370_v23  ;;  %v383_v24 = vlaneseq  ;;  %v536_v35 = vld [vmem:[%s1094_s3] ss:$0 sm:$0xff] }
 0x13d   : > { %v537_v37 = vld [vmem:[%s1095_s4] ss:$0 sm:$0xff] }
 0x13e   : > { %v384_v25 = vand.u32 127, %v383_v24 }
 0x140   : > { %vm385_vm1 = vcmp.lt.s32.totalorder %v384_v25, 32 }
 0x1c5   : > { %v381_v26 = vpop.xlane.xlu0 %380 }
 0x1c6   : > { %v382_v27 = vmul.f32 0.03125, %v381_v26 }
 0x1c8   : > { %v386_v28 = vsub.f32 %v370_v23, %v382_v27 }
 0x1ca   : > { %v387_v29 = vsel %vm385_vm1, %v386_v28, 0.0 }
 0x1cb   : > { %v388_v30 = vmul.f32 %v387_v29, %v387_v29 }
 0x1cd   : > { %389 = vadd.xlane.f32.xlu0 %v388_v30 }
 0x256   : > { %v390_v31 = vpop.xlane.xlu0 %389 }
 0x257   : > { %v391_v32 = vmul.f32 0.03125, %v390_v31 }
 0x259   : > { %v392_v33 = vadd.f32 1e-05, %v391_v32 }
 0x25b   : > { %687 = vrsqrt.f32 %v392_v33 }
 0x268   : > { %v688_v34 = vpop.eup %687 }
 0x269   : > { %v394_v36 = vmul.f32 %v688_v34, %v387_v29 }
 0x26b   : > { %v402_v38 = vmul.f32 %v536_v35, %v394_v36 }
 0x26d   : > { %v410_v39 = vadd.f32 %v537_v37, %v402_v38 }
 0x26f   : > { %411 = vst [vmem:[%s1010_s23] sm:$0xff] %v410_v39 }
 0x270 PF: > { %s539_s10 = sshll.u32 %s831_s22, 7  ;;  %s426_s13 = sshll.u32 %s1010_s23, 4  ;;  %s427_s13 = int_to_ptr.vmem [resolvable:$true] %s426_s13 }
 0x271   : > { %s424_s12 = scalar_lea.hbm %s1096_s5, %s539_s10  ;;  %s413_s7 = scalar_lea.sflag [#allocation5], %s998_s17 }
 0x272   : > { %s743_s30 = scalar_lea.vmem %s427_s13, 128  ;;  %s851_s28 = smov [#allocation8]  }
 0x273   : > { %p744_p2 = scmp.ne.s32.totalorder %s427_s13, %s743_s30  ;;  %s747_s15 = sshll.u32 %s851_s28, 4  ;;  %s748_s15 = int_to_ptr.vmem [resolvable:$false] %s747_s15 }
 0x274   : > { %s749_s29 = scalar_lea.vmem %s748_s15, 256  ;;  %p750_p5 = scmp.lt.s32.totalorder %s427_s13, %s748_s15 }
 0x275   : > { %p745_p0 = pnand %p744_p2, %p968_p9  ;;  %p751_p4 = scmp.lt.s32.totalorder %s749_s29, %s743_s30 }
 0x277   : > { %p746_p3 = pneg %p745_p0  ;;  %p752_p6 = por %p751_p4, %p750_p5 }
 0x279   : > { %p753_p7 = pnand %p752_p6, %p746_p3 }
 0x27b   : > { %756 = shalt.err (!%p753_p7)
}
 0x27c   : > { %s757_s22 = scalar_lea.hbm %s424_s12, 128  ;;  %s761_s14 = scalar_lea.hbm %s1096_s5, 256 }
 0x27d   : > { %p758_p11 = scmp.ne.s32.totalorder %s424_s12, %s757_s22  ;;  %p762_p8 = scmp.lt.s32.totalorder %s424_s12, %s1096_s5 }
 0x27e   : > { %p763_p1 = scmp.lt.s32.totalorder %s761_s14, %s757_s22 }
 0x27f   : > { %p759_p13 = pnand %p758_p11, %p968_p9 }
 0x280   : > { %p764_p12 = por %p763_p1, %p762_p8 }
 0x281   : > { %p760_p10 = pneg %p759_p13 }
 0x283   : > { %p765_p2 = pnand %p764_p12, %p760_p10 }
 0x285   : > { %768 = shalt.err (!%p765_p2)
}
 0x286   : > { %600 = dma.vmem_to_hbm [thread:$0]  (%p968_p9), %s427_s13, 128, %s424_s12, %s413_s7  }
 0x287 PF: > { %p617_p0 = scmp.ge.s32.totalorder %s843_s25, 2  ;;  %s438_s11 = sand.u32 1, %s815_s18  }
 0x288   : > { %p1111_p3 = scmp.ne.s32.totalorder %s1104_s6, 0  ;;  %s439_s10 = scalar_lea.sflag [#allocation5], %s438_s11 }
 0x28a   : > { %p611_p5 = pnand %p617_p0, %p1111_p3 }
 0x28c   : > { %p612_p4 = pneg %p611_p5 }
 0x28e   : > { %810 = dma.done.wait (%p612_p4), %s439_s10, 128  }
 0x28f   : > { %812 = vsyncadd (%p612_p4), %s439_s10, 4294967168  ;;  %s22_s25 = sadd.s32 1, %s843_s25   ;;  %s1112_s21 = sld [smem:[#allocation12_spill]] }
 0x290   : > { %p19_p6 = scmp.ge.s32.totalorder %s22_s25, 8   ;;  %s1113_s23 = sld [smem:[#allocation13_spill]] }
 0x291   : > { %s1114_s18 = smov %s819_s19  ;;  %s1115_s19 = smov %s823_s20 }
 0x292   : > { %s1116_s20 = smov %s983_s1  ;;  %s1117_s22 = smov %s839_s24 }
 0x293   : > { %s1118_s24 = smov %s1124_s16  ;;  %21 = sbr.rel (!%p19_p6) target bundleno = 10 (0xa), region = 103 }
 0x298   :  { %444 = vsyncpa [#allocation4], 1 }
 0x299   :  { %446 = vsyncpa [#allocation4 + $0x1], 1 }
 0x29a   :  { %447 = vsyncpa [#allocation7], 1 }
 0x29b   :  { %448 = vsyncpa [#allocation5], 1 }
 0x29c   :  { %450 = vsyncpa [#allocation5 + $0x1], 1 }

</bundles_post_ra>
